<compile_context>
chip_gen: v7x
topology: tpu7x:2x2x1
jax: 0.10.0
libtpu: 0.0.40
codegen_flags: <defaults>
</compile_context>

<pallas_src>
import functools
import math

import numpy as np
import jax
import jax.numpy as jnp
from jax.experimental import pallas as pl
from jax.experimental.pallas import tpu as pltpu

C_PAD = 128  # lane-dense (padded) class dimension


def _round_up(x, m):
    return ((x + m - 1) // m) * m


def _score_kernel(x_ref, yt_ref, scores_ref, aux_ref, *, num_classes, p_thresh):
    """One frame tile.

    x_ref      : [TILE_T, D]      raw image features
    yt_ref     : [D, C_PAD]       pre-normalized, pre-scaled, transposed, padded text features
    scores_ref : [TILE_T, C_PAD]  softmax scores (padded class columns are 0)
    aux_ref    : [TILE_T, 8]      col0 = argmax class, col1 = max score, col2 = threshold mask
    """
    x = x_ref[...].astype(jnp.float32)
    # L2-normalize frames along the feature dim (== x / x.norm(dim=-1, keepdim=True)).
    # NOTE: all-zero feature rows give rsqrt(0)=inf -> NaN, matching torch's 0/0.
    x = x * jax.lax.rsqrt(jnp.sum(x * x, axis=-1, keepdims=True))

    # logit_scale.exp() * x @ y.T  — scale and transpose are folded into yt on the host.
    logits = jnp.dot(x, yt_ref[...], preferred_element_type=jnp.float32)  # [TILE_T, C_PAD]

    col = jax.lax.broadcasted_iota(jnp.int32, logits.shape, 1)
    logits = jnp.where(col < num_classes, logits, -jnp.inf)  # kill padded classes

    # Numerically stable softmax over classes; padded cols contribute exp(-inf) = 0.
    m = jnp.max(logits, axis=-1, keepdims=True)
    e = jnp.exp(logits - m)
    sum_e = jnp.sum(e, axis=-1, keepdims=True)
    inv = pl.reciprocal(sum_e)           # exact (approx=False) to keep torch-softmax parity
    scores_ref[...] = e * inv

    # argmax over logits == argmax over scores (softmax is monotone); first index wins.
    cand = jnp.where(logits >= m, col, C_PAD)
    pred = jnp.min(cand, axis=-1, keepdims=True).astype(jnp.float32)      # [TILE_T, 1]
    pmax = inv                            # max score = exp(m - m) / sum_e = 1 / sum_e
    mask = jnp.where(pmax > p_thresh, 1.0, 0.0)

    # Pack the three per-frame scalars into one small output block.
    acol = jax.lax.broadcasted_iota(jnp.int32, (x.shape[0], 8), 1)
    aux_ref[...] = jnp.where(
        acol == 0, pred,
        jnp.where(acol == 1, pmax,
                  jnp.where(acol == 2, mask, 0.0)))


def compute_score_pallas(image_features, text_features, logit_scale, p, tile_t=512):
    """Returns (scores [T,C], pred [T] int32, pred_scores [T] f32, pred_mask [T] int32)."""
    T, D = image_features.shape
    C, D2 = text_features.shape
    assert D == D2 and 0 < C <= C_PAD

    # One-time text-feature prep (reused across every frame tile / every video):
    # normalize, fold in logit_scale.exp(), transpose to [D, C], pad classes to 128 lanes.
    y = text_features.astype(jnp.float32)
    y = y * jax.lax.rsqrt(jnp.sum(y * y, axis=-1, keepdims=True))
    y = y * jnp.float32(math.exp(float(logit_scale)))
    y_t = jnp.zeros((D, C_PAD), jnp.float32).at[:, :C].set(y.T)

    # Tile the frame axis; pad T so every tile is full (padded rows are sliced off).
    tile_t = max(8, _round_up(min(int(tile_t), T), 8))
    T_pad = _round_up(T, tile_t)
    x = image_features.astype(jnp.float32)
    if T_pad != T:
        x = jnp.pad(x, ((0, T_pad - T), (0, 0)))

    kernel = functools.partial(_score_kernel, num_classes=C, p_thresh=float(p))

    scores_pad, aux = pl.pallas_call(
        kernel,
        out_shape=(
            jax.ShapeDtypeStruct((T_pad, C_PAD), jnp.float32),  # scores (lane-dense)
            jax.ShapeDtypeStruct((T_pad, 8), jnp.float32),      # packed pred / max / mask
        ),
        grid=(T_pad // tile_t,),
        in_specs=[
            pl.BlockSpec((tile_t, D), lambda i: (i, 0)),        # frame tile, double-buffered
            pl.BlockSpec((D, C_PAD), lambda i: (0, 0)),         # text operand, VMEM-resident
        ],
        out_specs=(
            pl.BlockSpec((tile_t, C_PAD), lambda i: (i, 0)),
            pl.BlockSpec((tile_t, 8), lambda i: (i, 0)),
        ),
        compiler_params=pltpu.CompilerParams(
            dimension_semantics=("parallel",),   # shard frame tiles across v7x's 2 TCs
        ),
    )(x, y_t)

    scores = scores_pad[:T, :C]
    pred = aux[:T, 0].astype(jnp.int32)
    pred_scores = aux[:T, 1]
    pred_mask = aux[:T, 2].astype(jnp.int32)
    return scores, pred, pred_scores, pred_mask


# ---------------- host-side glue (mirrors the PyTorch python control flow) ---

def find_segments_of_ones(binary_mask):
    segments = []
    current_segment = None
    for idx, value in enumerate(binary_mask):
        if value == 1:
            if current_segment is None:
                current_segment = [idx]
        elif current_segment is not None:
            current_segment.append(idx - 1)
            segments.append(current_segment)
            current_segment = None
    if current_segment is not None:
        current_segment.append(len(binary_mask) - 1)
        segments.append(current_segment)
    return segments


def baseline_forward(video_name, image_features, text_features, logit_scale, p,
                     tile_t=512):
    scores, pred, pred_scores, pred_mask = compute_score_pallas(
        image_features, text_features, logit_scale, p, tile_t=tile_t)
    jax.block_until_ready(scores)

    scores_np = np.asarray(scores)
    mask_np = np.asarray(pred_mask)

    segments = find_segments_of_ones(mask_np)
    output = []
    for segment in segments:
        # NOTE: reproduces the original (end-exclusive) slice exactly.
        segment_scores = scores_np[segment[0]:segment[1]]
        if segment_scores.size > 0:
            segment_scores = segment_scores.mean(axis=0)
            seg_pred = int(segment_scores.argmax())
            output.append({'label': seg_pred,
                           'score': segment_scores,
                           'segment': segment})
    # TODO(synk): CLIP/CoCa backbone feature extraction, tokenization and
    # file/JSON/YAML loading have no Pallas equivalent; kernel operates on
    # precomputed features (the `from_features=True` path of forward()).
    return (video_name, output), (scores, pred, pred_scores, pred_mask)


if __name__ == "__main__":
    T, D, C = 48, 128, 8          # frames, feature dim, num text classes (small test)
    p = 0.2
    logit_scale = math.log(1.0 / 0.07)   # CLIP default logit_scale init

    key = jax.random.PRNGKey(0)
    k_img, k_txt = jax.random.split(key)
    image_features = jax.random.normal(k_img, (T, D), dtype=jnp.float32)
    text_features = jax.random.normal(k_txt, (C, D), dtype=jnp.float32)

    (video_name, output), (scores, pred, pred_scores, pred_mask) = baseline_forward(
        "video_test_0000000", image_features, text_features, logit_scale, p,
        tile_t=16)   # small tile so the test exercises a multi-tile grid

    # quick correctness check against a pure-JAX reference of compute_score
    xn = image_features / jnp.linalg.norm(image_features, axis=-1, keepdims=True)
    yn = text_features / jnp.linalg.norm(text_features, axis=-1, keepdims=True)
    ref_scores = jax.nn.softmax(math.exp(logit_scale) * xn @ yn.T, axis=-1)
    ref_pred = jnp.argmax(ref_scores, axis=-1)
    ref_pmax = jnp.max(ref_scores, axis=-1)
    ref_mask = jnp.where(ref_pmax > p, 1, 0)

    assert np.allclose(np.asarray(scores), np.asarray(ref_scores), atol=1e-5)
    assert np.array_equal(np.asarray(pred), np.asarray(ref_pred))
    assert np.allclose(np.asarray(pred_scores), np.asarray(ref_pmax), atol=1e-5)
    # avoid flaky comparison exactly at the threshold boundary
    stable = np.abs(np.asarray(ref_pmax) - p) > 1e-4
    assert np.array_equal(np.asarray(pred_mask)[stable], np.asarray(ref_mask)[stable])

    jax.block_until_ready(scores)
    print("KERNEL_OK")
</pallas_src>

<mosaic_0001>
module attributes {stable_mosaic.version = 11 : i64} {
  func.func @_score_kernel(%arg0: i32, %arg1: memref<16x128xf32, #tpu.memory_space<vmem>>, %arg2: memref<128x128xf32, #tpu.memory_space<vmem>>, %arg3: memref<16x128xf32, #tpu.memory_space<vmem>>, %arg4: memref<16x8xf32, #tpu.memory_space<vmem>>) attributes {dimension_semantics = [#tpu.dimension_semantics<parallel>], iteration_bounds = array<i64: 3>, scalar_prefetch = 0 : i64, scratch_operands = 0 : i64, tpu.core_type = #tpu.core_type<tc>, window_params = [{transform_indices = @transform_0, window_bounds = array<i64: 16, 128>}, {pipeline_mode = #tpu.pipeline_mode<synchronous>, transform_indices = @transform_1, window_bounds = array<i64: 128, 128>}, {transform_indices = @transform_2, window_bounds = array<i64: 16, 128>}, {transform_indices = @transform_3, window_bounds = array<i64: 16, 8>}]} {
    %c0 = arith.constant 0 : index
    %c0_0 = arith.constant 0 : index
    %0 = vector.load %arg1[%c0, %c0_0] : memref<16x128xf32, #tpu.memory_space<vmem>>, vector<16x128xf32>
    %1 = arith.mulf %0, %0 : vector<16x128xf32>
    %cst = arith.constant dense<0.000000e+00> : vector<16xf32>
    %2 = vector.multi_reduction <add>, %1, %cst [1] : vector<16x128xf32> to vector<16xf32>
    %3 = vector.shape_cast %2 : vector<16xf32> to vector<16x1xf32>
    %4 = math.rsqrt %3 : vector<16x1xf32>
    %5 = vector.broadcast %4 : vector<16x1xf32> to vector<16x128xf32>
    %6 = arith.mulf %0, %5 : vector<16x128xf32>
    %c0_1 = arith.constant 0 : index
    %c0_2 = arith.constant 0 : index
    %7 = vector.load %arg2[%c0_1, %c0_2] : memref<128x128xf32, #tpu.memory_space<vmem>>, vector<128x128xf32>
    %cst_3 = arith.constant dense<0.000000e+00> : vector<16x128xf32>
    %8 = tpu.matmul %6, %7, %cst_3 {dimension_numbers = #tpu.dot_dimension_numbers<[1], [0], [0], [1], [0, 0, 1, 1], [], []>} : vector<16x128xf32>, vector<128x128xf32>, vector<16x128xf32> -> vector<16x128xf32>
    %9 = tpu.iota {dimensions = array<i32: 1>} : vector<16x128xi32>
    %c8_i32 = arith.constant 8 : i32
    %10 = vector.broadcast %c8_i32 : i32 to vector<16x128xi32>
    %11 = arith.cmpi slt, %9, %10 : vector<16x128xi32>
    %cst_4 = arith.constant 0xFF800000 : f32
    %12 = vector.broadcast %cst_4 : f32 to vector<16x128xf32>
    %13 = arith.select %11, %8, %12 : vector<16x128xi1>, vector<16x128xf32>
    %cst_5 = arith.constant dense<0xFF800000> : vector<16xf32>
    %14 = vector.multi_reduction <maximumf>, %13, %cst_5 [1] : vector<16x128xf32> to vector<16xf32>
    %15 = vector.shape_cast %14 : vector<16xf32> to vector<16x1xf32>
    %16 = vector.broadcast %15 : vector<16x1xf32> to vector<16x128xf32>
    %17 = arith.subf %13, %16 : vector<16x128xf32>
    %18 = math.exp %17 : vector<16x128xf32>
    %cst_6 = arith.constant dense<0.000000e+00> : vector<16xf32>
    %19 = vector.multi_reduction <add>, %18, %cst_6 [1] : vector<16x128xf32> to vector<16xf32>
    %20 = vector.shape_cast %19 : vector<16xf32> to vector<16x1xf32>
    %21 = tpu.reciprocal %20 : vector<16x1xf32> -> vector<16x1xf32>
    %22 = vector.broadcast %21 : vector<16x1xf32> to vector<16x128xf32>
    %23 = arith.mulf %18, %22 : vector<16x128xf32>
    %c0_7 = arith.constant 0 : index
    %c0_8 = arith.constant 0 : index
    %24 = vector.load %arg3[%c0_7, %c0_8] : memref<16x128xf32, #tpu.memory_space<vmem>>, vector<16x128xf32>
    tpu.vector_store %arg3[%c0_7, %c0_8], %23 {strides = array<i32>} : memref<16x128xf32, #tpu.memory_space<vmem>>, vector<16x128xf32>,
    %25 = vector.broadcast %15 : vector<16x1xf32> to vector<16x128xf32>
    %26 = arith.cmpf oge, %13, %25 : vector<16x128xf32>
    %c128_i32 = arith.constant 128 : i32
    %27 = vector.broadcast %c128_i32 : i32 to vector<16x128xi32>
    %28 = arith.select %26, %9, %27 : vector<16x128xi1>, vector<16x128xi32>
    %cst_9 = arith.constant dense<2147483647> : vector<16xi32>
    %29 = vector.multi_reduction <minsi>, %28, %cst_9 [1] : vector<16x128xi32> to vector<16xi32>
    %30 = vector.shape_cast %29 : vector<16xi32> to vector<16x1xi32>
    %31 = arith.sitofp %30 : vector<16x1xi32> to vector<16x1xf32>
    %cst_10 = arith.constant 2.000000e-01 : f32
    %32 = vector.broadcast %cst_10 : f32 to vector<16x1xf32>
    %33 = arith.cmpf ogt, %21, %32 : vector<16x1xf32>
    %cst_11 = arith.constant 1.000000e+00 : f32
    %cst_12 = arith.constant 0.000000e+00 : f32
    %34 = vector.broadcast %cst_11 : f32 to vector<16x1xf32>
    %35 = vector.broadcast %cst_12 : f32 to vector<16x1xf32>
    %36 = arith.select %33, %34, %35 : vector<16x1xi1>, vector<16x1xf32>
    %37 = tpu.iota {dimensions = array<i32: 1>} : vector<16x8xi32>
    %c0_i32 = arith.constant 0 : i32
    %38 = vector.broadcast %c0_i32 : i32 to vector<16x8xi32>
    %39 = arith.cmpi eq, %37, %38 : vector<16x8xi32>
    %c1_i32 = arith.constant 1 : i32
    %40 = vector.broadcast %c1_i32 : i32 to vector<16x8xi32>
    %41 = arith.cmpi eq, %37, %40 : vector<16x8xi32>
    %c2_i32 = arith.constant 2 : i32
    %42 = vector.broadcast %c2_i32 : i32 to vector<16x8xi32>
    %43 = arith.cmpi eq, %37, %42 : vector<16x8xi32>
    %cst_13 = arith.constant 0.000000e+00 : f32
    %44 = vector.shape_cast %36 : vector<16x1xf32> to vector<16x1xf32>
    %45 = vector.broadcast %44 : vector<16x1xf32> to vector<16x8xf32>
    %46 = vector.broadcast %cst_13 : f32 to vector<16x8xf32>
    %47 = arith.select %43, %45, %46 : vector<16x8xi1>, vector<16x8xf32>
    %48 = vector.shape_cast %21 : vector<16x1xf32> to vector<16x1xf32>
    %49 = vector.broadcast %48 : vector<16x1xf32> to vector<16x8xf32>
    %50 = arith.select %41, %49, %47 : vector<16x8xi1>, vector<16x8xf32>
    %51 = vector.shape_cast %31 : vector<16x1xf32> to vector<16x1xf32>
    %52 = vector.broadcast %51 : vector<16x1xf32> to vector<16x8xf32>
    %53 = arith.select %39, %52, %50 : vector<16x8xi1>, vector<16x8xf32>
    %c0_14 = arith.constant 0 : index
    %c0_15 = arith.constant 0 : index
    %54 = vector.load %arg4[%c0_14, %c0_15] : memref<16x8xf32, #tpu.memory_space<vmem>>, vector<16x8xf32>
    tpu.vector_store %arg4[%c0_14, %c0_15], %53 {strides = array<i32>} : memref<16x8xf32, #tpu.memory_space<vmem>>, vector<16x8xf32>,
    return
  }
  func.func @transform_0(%arg0: i32) -> (i32, i32) {
    %c0_i32 = arith.constant 0 : i32
    %c0_i32_0 = arith.constant 0 : i32
    return %arg0, %c0_i32 : i32, i32
  }
  func.func @transform_1(%arg0: i32) -> (i32, i32) {
    %c0_i32 = arith.constant 0 : i32
    %c0_i32_0 = arith.constant 0 : i32
    %c0_i32_1 = arith.constant 0 : i32
    return %c0_i32, %c0_i32_0 : i32, i32
  }
  func.func @transform_2(%arg0: i32) -> (i32, i32) {
    %c0_i32 = arith.constant 0 : i32
    %c0_i32_0 = arith.constant 0 : i32
    return %arg0, %c0_i32 : i32, i32
  }
  func.func @transform_3(%arg0: i32) -> (i32, i32) {
    %c0_i32 = arith.constant 0 : i32
    %c0_i32_0 = arith.constant 0 : i32
    return %arg0, %c0_i32 : i32, i32
  }
}

</mosaic_0001>

<bundles_post_ra>
// kernel: tpu_custom_call.1
= control target key start
LH: loop header
LB: loop body
LE: loop exit
PB: predicated region body
PF: predicated region fallthrough
CT: control target
= control target key end

     0   :  { %9 = vsyncpa [#allocation3], 0  ;;  %s1106_s0 = inlined_call_operand.hbm [shape: f32[48,128], index: 0, kind: input, shape index: {}]   ;;  %s1107_s1 = inlined_call_operand.hbm [shape: f32[128,128], index: 1, kind: input, shape index: {}]   ;;  %s1108_s2 = inlined_call_operand.hbm [shape: f32[48,128], index: 2, kind: output, shape index: {0}]   ;;  %s1109_s3 = inlined_call_operand.vmem [shape: f32[48,8], index: 3, kind: output, shape index: {1}]  }
   0x1   :  { %11 = vsyncpa [#allocation3 + $0x1], 0 }
   0x2   :  { %12 = vsyncpa [#allocation6], 0 }
   0x3   :  { %13 = vsyncpa [#allocation4], 0 }
   0x4   :  { %15 = vsyncpa [#allocation4 + $0x1], 0  ;;  %s866_s12 = smov 0   ;;  %s868_s13 = smov 0  }
   0x5   :  { %s870_s14 = smov 0   ;;  %s872_s15 = smov 0  }
   0x6 LB: > { %s887_s16 = sadd.s32 4294967295, %s836_s15   ;;  %s529_s17 = sadd.s32 4294967294, %s836_s15   ;;  %s836_s15 = sphi %s872_s15, %s1128_s15   ;;  %s832_s14 = sphi %s870_s14, %s1127_s14   ;;  %s828_s13 = sphi %s868_s13, %s1126_s13   ;;  %s824_s12 = sphi %s866_s12, %s1125_s12  }
   0x7   : > { %p41_p0 = scmp.ne.s32.totalorder %s828_s13, %s824_s12  ;;  %p1110_p1 = scmp.eq.s32.totalorder %s887_s16, 0 }
   0x8   : > { %p92_p3 = scmp.eq.s32.totalorder %s529_s17, 2  ;;  %p530_p5 = scmp.ge.s32.totalorder %s836_s15, 1 }
   0x9   : > { %p896_p4 = por %p1110_p1, %p41_p0  ;;  %p125_p7 = scmp.lt.s32.totalorder %s836_s15, 4 }
   0xa   : > { %p901_p6 = por %p92_p3, %p41_p0  ;;  %s838_s21 = smov [#allocation5]  }
   0xb   : > { %s1113_s18 = scalar_select %p896_p4, 1, 0 }
   0xc   : > { %s1114_s19 = scalar_select %p901_p6, 1, 0 }
   0xd   : > { %p906_p8 = pnand %p530_p5, %p125_p7  ;;  %s137_s22 = sshll.u32 %s838_s21, 4  ;;  %s138_s22 = int_to_ptr.vmem [resolvable:$true] %s137_s22 }
   0xe   : > { %s919_s24 = sadd.s32 1, %s836_s15   ;;  %s28_s25 = sadd.s32 1, %s832_s14 }
   0xf   : > { %s1115_s20 = scalar_select %p906_p8, 1, 0 }
  0x10   : > { %p642_p9 = pneg %p906_p8  ;;  %s25_s26 = ssub.s32 %s836_s15, %s919_s24 }
  0x11   : > { %s708_s29 = scalar_lea.hbm %s1107_s1, 2048 }
  0x12   : > { %p914_p10 = pnand %p642_p9, %p1110_p1  ;;  %p709_p11 = scmp.ne.s32.totalorder %s1107_s1, %s708_s29 }
  0x13   : > { %p715_p3 = scmp.lt.u32.totalorder %s708_s29, %s1107_s1 }
  0x14   : > { %p710_p12 = pneg %p914_p10 }
  0x16   : > { %p711_p13 = pnand %p710_p12, %p709_p11 }
  0x18   : > { %p712_p0 = pneg %p711_p13 }
  0x1a   : > { %p717_p5 = pnand %p715_p3, %p712_p0 }
  0x1c   : > { %720 = shalt.err (!%p717_p5)
}
  0x1d   : > { %s721_s7 = scalar_lea.vmem %s138_s22, 2048  ;;  %p729_p2 = scmp.lt.s32.totalorder %s138_s22, %s138_s22 }
  0x1e   : > { %p722_p7 = scmp.ne.s32.totalorder %s138_s22, %s721_s7  ;;  %p730_p6 = scmp.lt.s32.totalorder %s721_s7, %s721_s7 }
  0x20   : > { %p724_p9 = pnand %p722_p7, %p710_p12  ;;  %p731_p4 = por %p730_p6, %p729_p2 }
  0x22   : > { %p725_p1 = pneg %p724_p9 }
  0x24   : > { %p732_p8 = pnand %p731_p4, %p725_p1 }
  0x26   : > { %735 = shalt.err (!%p732_p8)
}
  0x27   : > { %s839_s8 = smov 128   ;;  %s840_s9 = smov 8  }
  0x28   : > { %645 = dma.hbm_to_vmem [thread:$0]  (!%p914_p10), %s1107_s1, 2048, %s138_s22, [#allocation6], %s839_s8, %s839_s8, %s840_s9  }
  0x29   : > { %p26_p1 = scmp.eq.s32.totalorder %s25_s26, 0  ;;  %p35_p2 = scmp.ne.s32.totalorder %s832_s14, %s828_s13 }
  0x2a   : > { %p36_p4 = scmp.eq.s32.totalorder %s836_s15, 0  ;;  %p655_p6 = scmp.lt.s32.totalorder %s836_s15, 3 }
  0x2b   : > { %s948_s17 = scalar_select %p26_p1, %s832_s14, %s28_s25  }
  0x2c   : > { %p37_p8 = por %p36_p4, %p35_p2  ;;  %p1117_p11 = scmp.eq.s32.totalorder %s887_s16, 2 }
  0x2d   : > { %s151_s23 = sand.u32 1, %s832_s14   ;;  %s547_s27 = sshll.u32 %s836_s15, 8 }
  0x2e   : > { %p952_p12 = por %p1117_p11, %p35_p2  ;;  %s533_s28 = sshll.u32 %s151_s23, 4 }
  0x2f   : > { %s961_s4 = scalar_lea.hbm %s1106_s0, %s547_s27  ;;  %s155_s22 = scalar_lea.vmem [#allocation2], %s533_s28 }
  0x30   : > { %s162_s25 = sshll.u32 %s155_s22, 4  ;;  %p963_p10 = pnand %p655_p6, %p37_p8  ;;  %s967_s25 = int_to_ptr.vmem [resolvable:$true] %s162_s25 }
  0x31   : > { %s969_s5 = scalar_lea.sflag [#allocation3], %s151_s23  ;;  %s736_s6 = scalar_lea.hbm %s961_s4, 256 }
  0x32   : > { %p737_p13 = scmp.ne.s32.totalorder %s961_s4, %s736_s6  ;;  %p738_p0 = pneg %p963_p10 }
  0x33   : > { %s741_s11 = scalar_lea.hbm %s1106_s0, 768  ;;  %p742_p7 = scmp.lt.u32.totalorder %s961_s4, %s1106_s0 }
  0x34   : > { %p739_p3 = pnand %p738_p0, %p737_p13  ;;  %p743_p9 = scmp.lt.u32.totalorder %s741_s11, %s736_s6 }
  0x35   : > { %p745_p2 = scmp.lt.u32.totalorder %s736_s6, %s961_s4 }
  0x36   : > { %p740_p5 = pneg %p739_p3  ;;  %p744_p1 = por %p743_p9, %p742_p7 }
  0x38   : > { %p746_p4 = por %p745_p2, %p744_p1 }
  0x3a   : > { %p747_p6 = pnand %p746_p4, %p740_p5 }
  0x3c   : > { %750 = shalt.err (!%p747_p6)
}
  0x3d   : > { %s751_s23 = scalar_lea.vmem %s967_s25, 256  ;;  %s841_s29 = smov [#allocation2]  }
  0x3e   : > { %p752_p8 = scmp.ne.s32.totalorder %s967_s25, %s751_s23  ;;  %s756_s30 = sshll.u32 %s841_s29, 4  ;;  %s757_s30 = int_to_ptr.vmem [resolvable:$false] %s756_s30 }
  0x3f   : > { %s758_s22 = scalar_lea.vmem %s757_s30, 512  ;;  %p759_p3 = scmp.lt.s32.totalorder %s967_s25, %s757_s30 }
  0x40   : > { %p754_p11 = pnand %p752_p8, %p738_p0  ;;  %p760_p7 = scmp.lt.s32.totalorder %s758_s22, %s751_s23 }
  0x42   : > { %p755_p13 = pneg %p754_p11  ;;  %p761_p9 = por %p760_p7, %p759_p3 }
  0x44   : > { %p762_p1 = pnand %p761_p9, %p755_p13 }
  0x46   : > { %765 = shalt.err (!%p762_p1)
}
  0x47   : > { %649 = dma.hbm_to_vmem [thread:$0]  (!%p963_p10), %s961_s4, 256, %s967_s25, %s969_s5, %s839_s8, %s839_s8, %s840_s9  }
  0x48   : > { %p1120_p0 = scmp.ne.s32.totalorder %s1115_s20, 0 }
  0x49   : > { %s1003_s6 = sand.u32 (!%p1120_p0), 1, %s828_s13   ;;  %p1121_p5 = scmp.ne.s32.totalorder (!%p1120_p0), %s1113_s18, 0 }
  0x4a   : > { %174 = sbr.rel (%p1120_p0) target bundleno = 907 (0x38b), region = 28  ;;  %s537_s7 = sshll.u32 (!%p1120_p0), %s1003_s6, 4 }
  0x4b   : > { %s177_s10 = scalar_lea.sflag (!%p1120_p0), [#allocation3], %s1003_s6  ;;  %s180_s26 = scalar_lea.vmem (!%p1120_p0), [#allocation2], %s537_s7 }
  0x51   : > { %811 = dma.done.wait (%p1121_p5), %s177_s10, 256  }
  0x52   : > { %813 = vsyncadd (%p1121_p5), %s177_s10, 4294967040  ;;  %p1122_p10 = scmp.eq.s32.totalorder %s887_s16, 0 }
  0x54   : > { %815 = dma.done.wait (%p1122_p10), [#allocation6], 2048   ;;  %p1123_p2 = pmov %p1122_p10 }
  0x55   : > { %v220_v0 = vld [vmem:[%s180_s26] sm:$0xff]  ;;  %v221_v1 = vld [vmem:[%s180_s26 + $0x8] sm:$0xff]  ;;  %v323_v34 = vlaneseq  ;;  %s204_s18 = scalar_lea.vmem [#allocation7], %s537_s7  ;;  %s548_s20 = sshll.u32 %s887_s16, 8 }
  0x56   : > { %817 = vsyncadd (%p1123_p2), [#allocation6], 4294965248  ;;  %v232_v2 = vld [vmem:[#allocation5] sm:$0xff]  ;;  %v222_v3 = vmul.f32 %v220_v0, %v220_v0  ;;  %v233_v4 = vld [vmem:[#allocation5 + $0x8] sm:$0xff]  ;;  %v223_v9 = vmul.f32 %v221_v1, %v221_v1  ;;  %s417_s8 = sshll.u32 %s204_s18, 4  ;;  %s1040_s25 = scalar_lea.hbm %s1108_s2, %s548_s20  ;;  %s1042_s8 = int_to_ptr.vmem [resolvable:$true] %s417_s8 }
  0x57   : > { %v234_v5 = vld [vmem:[#allocation5 + $0x10] sm:$0xff]  ;;  %v235_v6 = vld [vmem:[#allocation5 + $0x18] sm:$0xff]  ;;  %v602_v7 = vpack.c.bf16 %v233_v4, %v232_v2  ;;  %v236_v10 = vld [vmem:[#allocation5 + $0x20] sm:$0xff]  ;;  %v1017_v35 = vand.u32 127, %v323_v34  ;;  %s399_s5 = scalar_lea.sflag [#allocation4], %s1003_s6  ;;  %s766_s11 = scalar_lea.vmem %s1042_s8, 256 }
  0x58   : > { %v606_v8 = vpack.c.bf16 %v235_v6, %v234_v5  ;;  %224 = vadd.xlane.f32.xlu0 %v222_v3  ;;  %v237_v11 = vld [vmem:[#allocation5 + $0x28] sm:$0xff]  ;;  %v238_v13 = vld [vmem:[#allocation5 + $0x30] sm:$0xff]  ;;  %v239_v14 = vld [vmem:[#allocation5 + $0x38] sm:$0xff]  ;;  %p767_p4 = scmp.ne.s32.totalorder %s1042_s8, %s766_s11  ;;  %s842_s27 = smov [#allocation7]  }
  0x59   : > { %603 = vmatprep.subr.bf16.mxu0 %v602_v7  ;;  %v610_v12 = vpack.c.bf16 %v237_v11, %v236_v10  ;;  %v614_v15 = vpack.c.bf16 %v239_v14, %v238_v13  ;;  %v240_v16 = vld [vmem:[#allocation5 + $0x40] sm:$0xff]  ;;  %v241_v17 = vld [vmem:[#allocation5 + $0x48] sm:$0xff]  ;;  %v242_v19 = vld [vmem:[#allocation5 + $0x50] sm:$0xff]  ;;  %vm325_vm0 = vcmp.lt.s32.totalorder %v1017_v35, 8  ;;  %s770_s28 = sshll.u32 %s842_s27, 4  ;;  %s771_s28 = int_to_ptr.vmem [resolvable:$false] %s770_s28 }
  0x5a   : > { %605 = vmatpush3.bf16.msra.mxu0 %v602_v7  ;;  %v618_v18 = vpack.c.bf16 %v241_v17, %v240_v16  ;;  %v243_v20 = vld [vmem:[#allocation5 + $0x58] sm:$0xff]  ;;  %v244_v22 = vld [vmem:[#allocation5 + $0x60] sm:$0xff]  ;;  %v245_v23 = vld [vmem:[#allocation5 + $0x68] sm:$0xff]  ;;  %p768_p6 = pnand %p767_p4, %p952_p12  ;;  %s772_s23 = scalar_lea.vmem %s771_s28, 512 }
  0x5b   : > { %607 = vmatprep.subr.bf16.mxu0 %v606_v8  ;;  %v622_v21 = vpack.c.bf16 %v243_v20, %v242_v19  ;;  %v626_v24 = vpack.c.bf16 %v245_v23, %v244_v22  ;;  %v246_v25 = vld [vmem:[#allocation5 + $0x70] sm:$0xff]  ;;  %v247_v26 = vld [vmem:[#allocation5 + $0x78] sm:$0xff]  ;;  %p773_p11 = scmp.lt.s32.totalorder %s1042_s8, %s771_s28  ;;  %p774_p13 = scmp.lt.s32.totalorder %s772_s23, %s766_s11 }
  0x5c   : > { %226 = vadd.xlane.f32.xlu0 %v223_v9  ;;  %v630_v27 = vpack.c.bf16 %v247_v26, %v246_v25  ;;  %p769_p8 = pneg %p768_p6 }
  0x5d   : > { %p775_p3 = por %p774_p13, %p773_p11 }
  0x5e   : > { %609 = vmatpush3.bf16.msra.mxu0 %v606_v8 }
  0x5f   : > { %611 = vmatprep.subr.bf16.mxu0 %v610_v12  ;;  %p776_p7 = pnand %p775_p3, %p769_p8 }
  0x62   : > { %613 = vmatpush3.bf16.msra.mxu0 %v610_v12 }
  0x63   : > { %615 = vmatprep.subr.bf16.mxu0 %v614_v15 }
  0x66   : > { %617 = vmatpush3.bf16.msra.mxu0 %v614_v15 }
  0x67   : > { %619 = vmatprep.subr.bf16.mxu0 %v618_v18 }
  0x6a   : > { %621 = vmatpush3.bf16.msra.mxu0 %v618_v18 }
  0x6b   : > { %623 = vmatprep.subr.bf16.mxu0 %v622_v21 }
  0x6e   : > { %625 = vmatpush3.bf16.msra.mxu0 %v622_v21 }
  0x6f   : > { %627 = vmatprep.subr.bf16.mxu0 %v626_v24 }
  0x72   : > { %629 = vmatpush3.bf16.msra.mxu0 %v626_v24 }
  0x73   : > { %631 = vmatprep.subr.bf16.mxu0 %v630_v27 }
  0x76   : > { %633 = vmatpush3.bf16.msra.mxu0 %v630_v27 }
  0xe5   : > { %v225_v28 = vpop.xlane.xlu0 %224 }
  0xe6   : > { %696 = vrsqrt.f32 %v225_v28 }
  0xe9   : > { %v227_v29 = vpop.xlane.xlu0 %226 }
  0xea   : > { %698 = vrsqrt.f32 %v227_v29 }
  0xf0   : > { %v697_v30 = vpop.eup %696 }
  0xf1   : > { %v230_v31 = vmul.f32 %v697_v30, %v220_v0 }
  0xf3   : > { %599 = vmatprep.mubr.f32.mxu0 %v230_v31 }
  0xf4   : > { %v699_v32 = vpop.eup %698 }
  0xf5   : > { %v231_v33 = vmul.f32 %v699_v32, %v221_v1 }
  0xf7   : > { %600 = vmatmul.mubr.f32.vlgmr.msra.gmra.mrb[0].mxu0 %v231_v33 }
 0x1ca   : > { %v601_v36 = vpop.f32.mrb[0].mxu0 }
 0x1cb   : > { %v314_v37 = vpop.f32.mrb[1].mxu0  ;;  %v327_v39 = vsel %vm325_vm0, %v601_v36, -inf }
 0x1cc   : > { %v326_v38 = vsel %vm325_vm0, %v314_v37, -inf }
 0x1cd   : > { %328 = vmax.xlane.f32.xlu1 %v326_v38 }
 0x1d1   : > { %330 = vmax.xlane.f32.xlu1 %v327_v39 }
 0x25a   : > { %v329_v40 = vpop.xlane.xlu1 %328 }
 0x25b   : > { %v332_v41 = vsub.f32 %v326_v38, %v329_v40  ;;  %vm348_vm1 = vcmp.ge.f32.partialorder %v326_v38, %v329_v40 }
 0x25c   : > { %v350_v42 = vsel %vm348_vm1, %v1017_v35, 128 }
 0x25d   : > { %v334_v43 = vmul.f32 1.442695, %v332_v41  ;;  %v353_v44 = vshra.s32 %v350_v42, 16  ;;  %v352_v54 = vand.u32 65535, %v350_v42 }
 0x25e   : > { %v331_v45 = vpop.xlane.xlu1 %330 }
 0x25f   : > { %700 = vpow2.f32 %v334_v43  ;;  %v333_v46 = vsub.f32 %v327_v39, %v331_v45  ;;  %vm349_vm2 = vcmp.ge.f32.partialorder %v327_v39, %v331_v45  ;;  %v355_v47 = vcvt.s32.f32 %v353_v44 }
 0x260   : > { %v351_v48 = vsel %vm349_vm2, %v1017_v35, 128  ;;  %v354_v56 = vcvt.s32.f32 %v352_v54 }
 0x261   : > { %v336_v49 = vmul.f32 1.442695, %v333_v46  ;;  %356 = vmin.xlane.f32.xlu0 %v355_v47  ;;  %v367_v50 = vshra.s32 %v351_v48, 16  ;;  %v366_v57 = vand.u32 65535, %v351_v48 }
 0x263   : > { %702 = vpow2.f32 %v336_v49  ;;  %v369_v51 = vcvt.s32.f32 %v367_v50  ;;  %v368_v60 = vcvt.s32.f32 %v366_v57 }
 0x265   : > { %370 = vmin.xlane.f32.xlu1 %v369_v51 }
 0x269   : > { %v701_v52 = vpop.eup %700 }
 0x26a   : > { %338 = vadd.xlane.f32.xlu0 %v701_v52 }
 0x26d   : > { %v703_v53 = vpop.eup %702 }
 0x26e   : > { %340 = vadd.xlane.f32.xlu1 %v703_v53 }
 0x2ee   : > { %v1022_v55 = vpop.xlane.xlu0 %356 }
 0x2ef   : > { %vm358_vm3 = vcmp.eq.f32.partialorder %v355_v47, %v1022_v55 }
 0x2f0   : > { %v359_v58 = vsel %vm358_vm3, %v354_v56, inf }
 0x2f1   : > { %360 = vmin.xlane.f32.xlu0 %v359_v58 }
 0x2f2   : > { %v1025_v59 = vpop.xlane.xlu1 %370 }
 0x2f3   : > { %vm372_vm4 = vcmp.eq.f32.partialorder %v369_v51, %v1025_v59 }
 0x2f4   : > { %v373_v61 = vsel %vm372_vm4, %v368_v60, inf }
 0x2f5   : > { %374 = vmin.xlane.f32.xlu1 %v373_v61 }
 0x2f7   : > { %v339_v62 = vpop.xlane.xlu0 %338 }
 0x2f8   : > { %704 = vrcp.f32 %v339_v62 }
 0x2fb   : > { %v341_v63 = vpop.xlane.xlu1 %340 }
 0x2fc   : > { %706 = vrcp.f32 %v341_v63 }
 0x302   : > { %v1028_v0 = vpop.eup %704 }
 0x303   : > { %v344_v1 = vmul.f32 %v1028_v0, %v701_v52 }
 0x305   : > { %346 = vst [vmem:[%s204_s18] sm:$0xff] %v344_v1 }
 0x306   : > { %v1033_v2 = vpop.eup %706 }
 0x307   : > { %v345_v3 = vmul.f32 %v1033_v2, %v703_v53 }
 0x309   : > { %347 = vst [vmem:[%s204_s18 + $0x8] sm:$0xff] %v345_v3 }
 0x30a   : > { %779 = shalt.err (!%p776_p7)
}
 0x30b   : > { %s780_s29 = scalar_lea.hbm %s1040_s25, 256  ;;  %s784_s7 = scalar_lea.hbm %s1108_s2, 768 }
 0x30c   : > { %p781_p9 = scmp.ne.s32.totalorder %s1040_s25, %s780_s29  ;;  %p785_p5 = scmp.lt.u32.totalorder %s1040_s25, %s1108_s2 }
 0x30d   : > { %p786_p10 = scmp.lt.u32.totalorder %s784_s7, %s780_s29  ;;  %p788_p4 = scmp.lt.u32.totalorder %s780_s29, %s1040_s25 }
 0x30e   : > { %p782_p1 = pnand %p781_p9, %p952_p12 }
 0x30f   : > { %p787_p2 = por %p786_p10, %p785_p5 }
 0x310   : > { %p783_p0 = pneg %p782_p1 }
 0x311   : > { %p789_p6 = por %p788_p4, %p787_p2 }
 0x313   : > { %p790_p8 = pnand %p789_p6, %p783_p0 }
 0x315   : > { %793 = shalt.err (!%p790_p8)
}
 0x316   : > { %s843_s18 = smov 128   ;;  %s844_s20 = smov 8   ;;  %v363_v4 = vcvt.f32.s32 %v1022_v55  ;;  %vm382_vm5 = vcmp.gt.f32.partialorder %v1028_v0, 0.2  ;;  %v845_v5 = vmov 0.0   ;;  %vm388_vm6 = vcmp.eq.s32.totalorder %v1017_v35, 2 }
 0x317   : > { %640 = dma.vmem_to_hbm [thread:$0]  (%p952_p12), %s1042_s8, 256, %s1040_s25, %s399_s5, %s843_s18, %s843_s18, %s844_s20   ;;  %v384_v6 = vsel %vm382_vm5, 1.0, %v845_v5  ;;  %v377_v9 = vcvt.f32.s32 %v1025_v59  ;;  %vm383_vm7 = vcmp.gt.f32.partialorder %v1033_v2, 0.2  ;;  %vm387_vm8 = vcmp.eq.s32.totalorder %v1017_v35, 1 }
 0x318   : > { %s540_s9 = sshll.u32 %s887_s16, 1  ;;  %v364_v8 = vshll.u32 %v363_v4, 16  ;;  %v389_v11 = vsel %vm388_vm6, %v384_v6, 0.0  ;;  %vm386_vm9 = vcmp.eq.s32.totalorder %v1017_v35, 0  ;;  %v385_v13 = vsel %vm383_vm7, 1.0, %v845_v5 }
 0x319   : > { %p215_p11 = scmp.lt.s32.totalorder %s540_s9, 5  ;;  %v378_v15 = vshll.u32 %v377_v9, 16  ;;  %vm395_vm10 = vcmask 64512   ;;  %v391_v18 = vsel %vm387_vm8, %v1028_v0, %v389_v11  ;;  %v390_v20 = vsel %vm388_vm6, %v385_v13, 0.0 }
 0x31a   : > { %v392_v23 = vsel %vm387_vm8, %v1033_v2, %v390_v20 }
 0x31b   : > { %s1130_s9 = smov (!%p215_p11, %s540_s9), 5 }
 0x31c   : > { %s541_s21 = sshll.u32 %s1130_s9, 3 }
 0x31d   : > { %s218_s8 = scalar_lea.vmem %s1109_s3, %s541_s21 }
 0x37e   : > { %v361_v7 = vpop.xlane.xlu0 %360 }
 0x37f   : > { %v362_v10 = vcvt.f32.s32 %v361_v7 }
 0x381   : > { %v365_v12 = vadd.s32 %v364_v8, %v362_v10 }
 0x382   : > { %v375_v14 = vpop.xlane.xlu1 %374 }
 0x383   : > { %v380_v16 = vcvt.s32.f32 %v365_v12  ;;  %v376_v17 = vcvt.f32.s32 %v375_v14 }
 0x385   : > { %v393_v19 = vsel %vm386_vm9, %v380_v16, %v391_v18  ;;  %v379_v21 = vadd.s32 %v378_v15, %v376_v17 }
 0x386   : > { %396 = vst.msk [vmem:[%s218_s8] sm:$0xff] %vm395_vm10, %v393_v19 }
 0x387   : > { %v381_v22 = vcvt.s32.f32 %v379_v21 }
 0x389   : > { %v394_v24 = vsel %vm386_vm9, %v381_v22, %v392_v23 }
 0x38a   : > { %397 = vst.msk [vmem:[%s218_s8 + $0x8] sm:$0xff] %vm395_vm10, %v394_v24 }
 0x38b PF: > { %p657_p12 = scmp.ge.s32.totalorder %s836_s15, 2  ;;  %s436_s4 = sand.u32 1, %s824_s12  }
 0x38c   : > { %p1124_p13 = scmp.ne.s32.totalorder %s1114_s19, 0  ;;  %s437_s25 = scalar_lea.sflag [#allocation4], %s436_s4 }
 0x38e   : > { %p651_p3 = pnand %p657_p12, %p1124_p13 }
 0x390   : > { %819 = dma.done.wait (!%p651_p3), %s437_s25, 256  }
 0x391   : > { %821 = vsyncadd (!%p651_p3), %s437_s25, 4294967040  ;;  %p18_p7 = scmp.ge.s32.totalorder %s919_s24, 5   ;;  %s1125_s12 = smov %s828_s13 }
 0x392   : > { %s1126_s13 = smov %s832_s14  ;;  %s1127_s14 = smov %s948_s17 }
 0x393   : > { %s1128_s15 = smov %s919_s24  ;;  %20 = sbr.rel (!%p18_p7) target bundleno = 6 (0x6), region = 89 }
 0x39a   :  { %450 = vsyncpa [#allocation3], 1 }
 0x39b   :  { %452 = vsyncpa [#allocation3 + $0x1], 1 }
 0x39c   :  { %453 = vsyncpa [#allocation6], 1 }
 0x39d   :  { %454 = vsyncpa [#allocation4], 1 }
 0x39e   :  { %456 = vsyncpa [#allocation4 + $0x1], 1 }

</bundles_post_ra>
